<compile_context>
chip_gen: v5e
topology: v5e:2x2
jax: 0.10.0
libtpu: 0.0.40
codegen_flags: <defaults>
</compile_context>

<pallas_src>
import functools

import jax
import jax.numpy as jnp
from jax.experimental import pallas as pl
from jax.experimental.pallas import tpu as pltpu


def rnn_kernel(tok_ref, emb_ref, wih_ref, whh_ref, b_ref, wfc_ref, bfc_ref,
               out_ref, *, seq_len, batch, vocab_dim):
    """Fused embedding -> RNN(tanh) -> fc.

    tok_ref: (seq_len*batch, 1) int32 token ids, time-major.
    out_ref: (batch, 128) f32 = h_final @ wfc_pad + bfc_pad (col 0 is the fc output).
    """
    sb = seq_len * batch

    # --- In-kernel embedding gather as an exact one-hot matmul (MXU). ---
    tok = tok_ref[...]                                           # (sb, 1) int32
    onehot = (tok == jax.lax.broadcasted_iota(jnp.int32, (sb, vocab_dim), 1)
              ).astype(jnp.float32)                              # (sb, vocab)
    embedded = jnp.dot(onehot, emb_ref[...],
                       preferred_element_type=jnp.float32)       # (sb, emb)

    # --- Hoisted input projection + fused bias (off the serial chain). ---
    pre = (jnp.dot(embedded, wih_ref[...],
                   preferred_element_type=jnp.float32)
           + b_ref[...])                                         # (sb, hidden)

    whh = whh_ref[...]

    # --- Serial recurrence, fully unrolled; pre stays in vregs so the per-step
    # slice is static. Step 0 skips the dot since h0 == 0.
    # TODO(synk): for long sequences, bound the unroll / chunk over a grid axis
    # with h carried in VMEM scratch (mandatory on v7x's smaller 64 MiB VMEM).
    # TODO(synk): hold W_hh in the MXU weight registers across the loop via
    # pltpu.matmul_push_rhs / matmul_acc_lhs, and cast MXU operands to bf16 on
    # v6e/v7x to shorten the per-step critical path.
    h = jnp.tanh(pre[0:batch, :])                                # (batch, hidden)
    for t in range(1, seq_len):
        pre_t = pre[t * batch:(t + 1) * batch, :]
        h = jnp.tanh(pre_t + jnp.dot(h, whh,
                                     preferred_element_type=jnp.float32))

    # --- Fused fc, lane-dense (zero-padded to 128 output columns). ---
    out_ref[...] = (jnp.dot(h, wfc_ref[...],
                            preferred_element_type=jnp.float32)
                    + bfc_ref[...])


def simple_rnn_forward(x_tokens, params):
    """x_tokens: (seq_len, batch) int32 token ids.  Returns (batch, 1) f32."""
    emb_table = params["embedding"]            # (vocab, emb_dim)
    wih = params["w_ih"]                       # (emb_dim, hidden)  pre-transposed
    whh = params["w_hh"]                       # (hidden, hidden)   pre-transposed
    b = (params["b_ih"] + params["b_hh"])      # fused RNN bias
    wfc = params["w_fc"]                       # (hidden, 1)        pre-transposed
    bfc = params["b_fc"]                       # (1,)

    seq_len, batch = x_tokens.shape
    vocab_dim, emb_dim = emb_table.shape
    hidden_dim = whh.shape[0]

    FC_PAD = 128  # lane-dense output width; column 0 is the real fc output.
    wfc_pad = jnp.zeros((hidden_dim, FC_PAD), jnp.float32).at[:, :1].set(wfc)
    bfc_pad = jnp.zeros((1, FC_PAD), jnp.float32).at[:, :1].set(bfc.reshape(1, 1))
    b2 = b.reshape(1, hidden_dim)

    # Time-major flatten so rows [t*batch : (t+1)*batch] belong to time step t.
    tok2d = x_tokens.reshape(seq_len * batch, 1).astype(jnp.int32)

    kernel = functools.partial(rnn_kernel, seq_len=seq_len, batch=batch,
                               vocab_dim=vocab_dim)
    vmem = pltpu.MemorySpace.VMEM

    out_pad = pl.pallas_call(
        kernel,
        out_shape=jax.ShapeDtypeStruct((batch, FC_PAD), jnp.float32),
        in_specs=[pl.BlockSpec(memory_space=vmem) for _ in range(7)],
        out_specs=pl.BlockSpec(memory_space=vmem),
    )(tok2d, emb_table, wih, whh, b2, wfc_pad, bfc_pad)

    return out_pad[:, :1]                      # (batch, 1)


def reference_forward(x_tokens, params):
    """Pure-JAX reference matching PyTorch semantics."""
    embedded = jnp.take(params["embedding"], x_tokens, axis=0)  # (seq, batch, emb)
    b = params["b_ih"] + params["b_hh"]
    hidden_dim = params["w_hh"].shape[0]

    def step(h, x_t):
        h_new = jnp.tanh(x_t @ params["w_ih"] + h @ params["w_hh"] + b)
        return h_new, None

    h0 = jnp.zeros((x_tokens.shape[1], hidden_dim), jnp.float32)
    h_final, _ = jax.lax.scan(step, h0, embedded)
    return h_final @ params["w_fc"] + params["b_fc"]


def init_params(key, vocab_dim, emb_dim, hidden_dim):
    ks = jax.random.split(key, 7)
    scale = 0.1
    return {
        "embedding": scale * jax.random.normal(ks[0], (vocab_dim, emb_dim), jnp.float32),
        # Stored pre-transposed relative to PyTorch (which keeps (out, in)).
        "w_ih": scale * jax.random.normal(ks[1], (emb_dim, hidden_dim), jnp.float32),
        "w_hh": scale * jax.random.normal(ks[2], (hidden_dim, hidden_dim), jnp.float32),
        "b_ih": scale * jax.random.normal(ks[3], (hidden_dim,), jnp.float32),
        "b_hh": scale * jax.random.normal(ks[4], (hidden_dim,), jnp.float32),
        "w_fc": scale * jax.random.normal(ks[5], (hidden_dim, 1), jnp.float32),
        "b_fc": scale * jax.random.normal(ks[6], (1,), jnp.float32),
    }


if __name__ == "__main__":
    # hidden chosen as a multiple of 128 (lane-dense); batch padded to sublane 8.
    vocab_dim, emb_dim, hidden_dim = 50, 32, 128
    seq_len, batch = 8, 8

    key = jax.random.PRNGKey(0)
    k_params, k_tokens = jax.random.split(key)
    params = init_params(k_params, vocab_dim, emb_dim, hidden_dim)
    x_tokens = jax.random.randint(k_tokens, (seq_len, batch), 0, vocab_dim, jnp.int32)

    out = simple_rnn_forward(x_tokens, params)
    out = jax.block_until_ready(out)

    ref = reference_forward(x_tokens, params)
    assert out.shape == (batch, 1)
    assert jnp.allclose(out, ref, atol=1e-5, rtol=1e-5), (out, ref)

    print("KERNEL_OK")
</pallas_src>

<mosaic_0001>
module attributes {stable_mosaic.version = 11 : i64} {
  func.func @rnn_kernel(%arg0: memref<64x1xi32, #tpu.memory_space<vmem>>, %arg1: memref<50x32xf32, #tpu.memory_space<vmem>>, %arg2: memref<32x128xf32, #tpu.memory_space<vmem>>, %arg3: memref<128x128xf32, #tpu.memory_space<vmem>>, %arg4: memref<1x128xf32, #tpu.memory_space<vmem>>, %arg5: memref<128x128xf32, #tpu.memory_space<vmem>>, %arg6: memref<1x128xf32, #tpu.memory_space<vmem>>, %arg7: memref<8x128xf32, #tpu.memory_space<vmem>>) attributes {dimension_semantics = [], scalar_prefetch = 0 : i64, scratch_operands = 0 : i64, tpu.core_type = #tpu.core_type<tc>} {
    %c0 = arith.constant 0 : index
    %c0_0 = arith.constant 0 : index
    %0 = vector.load %arg0[%c0, %c0_0] : memref<64x1xi32, #tpu.memory_space<vmem>>, vector<64x1xi32>
    %1 = tpu.iota {dimensions = array<i32: 1>} : vector<64x50xi32>
    %2 = vector.broadcast %0 : vector<64x1xi32> to vector<64x50xi32>
    %3 = arith.cmpi eq, %2, %1 : vector<64x50xi32>
    %4 = arith.extui %3 : vector<64x50xi1> to vector<64x50xi32>
    %5 = arith.sitofp %4 : vector<64x50xi32> to vector<64x50xf32>
    %c0_1 = arith.constant 0 : index
    %c0_2 = arith.constant 0 : index
    %6 = vector.load %arg1[%c0_1, %c0_2] : memref<50x32xf32, #tpu.memory_space<vmem>>, vector<50x32xf32>
    %cst = arith.constant dense<0.000000e+00> : vector<64x32xf32>
    %7 = tpu.matmul %5, %6, %cst {dimension_numbers = #tpu.dot_dimension_numbers<[1], [0], [0], [1], [0, 0, 1, 1], [], []>} : vector<64x50xf32>, vector<50x32xf32>, vector<64x32xf32> -> vector<64x32xf32>
    %c0_3 = arith.constant 0 : index
    %c0_4 = arith.constant 0 : index
    %8 = vector.load %arg2[%c0_3, %c0_4] : memref<32x128xf32, #tpu.memory_space<vmem>>, vector<32x128xf32>
    %cst_5 = arith.constant dense<0.000000e+00> : vector<64x128xf32>
    %9 = tpu.matmul %7, %8, %cst_5 {dimension_numbers = #tpu.dot_dimension_numbers<[1], [0], [0], [1], [0, 0, 1, 1], [], []>} : vector<64x32xf32>, vector<32x128xf32>, vector<64x128xf32> -> vector<64x128xf32>
    %c0_6 = arith.constant 0 : index
    %c0_7 = arith.constant 0 : index
    %10 = vector.load %arg4[%c0_6, %c0_7] : memref<1x128xf32, #tpu.memory_space<vmem>>, vector<1x128xf32>
    %11 = vector.broadcast %10 : vector<1x128xf32> to vector<64x128xf32>
    %12 = arith.addf %9, %11 : vector<64x128xf32>
    %c0_8 = arith.constant 0 : index
    %c0_9 = arith.constant 0 : index
    %13 = vector.load %arg3[%c0_8, %c0_9] : memref<128x128xf32, #tpu.memory_space<vmem>>, vector<128x128xf32>
    %14 = vector.extract_strided_slice %12 {offsets = [0, 0], sizes = [8, 128], strides = [1, 1]} : vector<64x128xf32> to vector<8x128xf32>
    %15 = math.tanh %14 : vector<8x128xf32>
    %16 = vector.extract_strided_slice %12 {offsets = [8, 0], sizes = [8, 128], strides = [1, 1]} : vector<64x128xf32> to vector<8x128xf32>
    %cst_10 = arith.constant dense<0.000000e+00> : vector<8x128xf32>
    %17 = tpu.matmul %15, %13, %cst_10 {dimension_numbers = #tpu.dot_dimension_numbers<[1], [0], [0], [1], [0, 0, 1, 1], [], []>} : vector<8x128xf32>, vector<128x128xf32>, vector<8x128xf32> -> vector<8x128xf32>
    %18 = arith.addf %16, %17 : vector<8x128xf32>
    %19 = math.tanh %18 : vector<8x128xf32>
    %20 = vector.extract_strided_slice %12 {offsets = [16, 0], sizes = [8, 128], strides = [1, 1]} : vector<64x128xf32> to vector<8x128xf32>
    %cst_11 = arith.constant dense<0.000000e+00> : vector<8x128xf32>
    %21 = tpu.matmul %19, %13, %cst_11 {dimension_numbers = #tpu.dot_dimension_numbers<[1], [0], [0], [1], [0, 0, 1, 1], [], []>} : vector<8x128xf32>, vector<128x128xf32>, vector<8x128xf32> -> vector<8x128xf32>
    %22 = arith.addf %20, %21 : vector<8x128xf32>
    %23 = math.tanh %22 : vector<8x128xf32>
    %24 = vector.extract_strided_slice %12 {offsets = [24, 0], sizes = [8, 128], strides = [1, 1]} : vector<64x128xf32> to vector<8x128xf32>
    %cst_12 = arith.constant dense<0.000000e+00> : vector<8x128xf32>
    %25 = tpu.matmul %23, %13, %cst_12 {dimension_numbers = #tpu.dot_dimension_numbers<[1], [0], [0], [1], [0, 0, 1, 1], [], []>} : vector<8x128xf32>, vector<128x128xf32>, vector<8x128xf32> -> vector<8x128xf32>
    %26 = arith.addf %24, %25 : vector<8x128xf32>
    %27 = math.tanh %26 : vector<8x128xf32>
    %28 = vector.extract_strided_slice %12 {offsets = [32, 0], sizes = [8, 128], strides = [1, 1]} : vector<64x128xf32> to vector<8x128xf32>
    %cst_13 = arith.constant dense<0.000000e+00> : vector<8x128xf32>
    %29 = tpu.matmul %27, %13, %cst_13 {dimension_numbers = #tpu.dot_dimension_numbers<[1], [0], [0], [1], [0, 0, 1, 1], [], []>} : vector<8x128xf32>, vector<128x128xf32>, vector<8x128xf32> -> vector<8x128xf32>
    %30 = arith.addf %28, %29 : vector<8x128xf32>
    %31 = math.tanh %30 : vector<8x128xf32>
    %32 = vector.extract_strided_slice %12 {offsets = [40, 0], sizes = [8, 128], strides = [1, 1]} : vector<64x128xf32> to vector<8x128xf32>
    %cst_14 = arith.constant dense<0.000000e+00> : vector<8x128xf32>
    %33 = tpu.matmul %31, %13, %cst_14 {dimension_numbers = #tpu.dot_dimension_numbers<[1], [0], [0], [1], [0, 0, 1, 1], [], []>} : vector<8x128xf32>, vector<128x128xf32>, vector<8x128xf32> -> vector<8x128xf32>
    %34 = arith.addf %32, %33 : vector<8x128xf32>
    %35 = math.tanh %34 : vector<8x128xf32>
    %36 = vector.extract_strided_slice %12 {offsets = [48, 0], sizes = [8, 128], strides = [1, 1]} : vector<64x128xf32> to vector<8x128xf32>
    %cst_15 = arith.constant dense<0.000000e+00> : vector<8x128xf32>
    %37 = tpu.matmul %35, %13, %cst_15 {dimension_numbers = #tpu.dot_dimension_numbers<[1], [0], [0], [1], [0, 0, 1, 1], [], []>} : vector<8x128xf32>, vector<128x128xf32>, vector<8x128xf32> -> vector<8x128xf32>
    %38 = arith.addf %36, %37 : vector<8x128xf32>
    %39 = math.tanh %38 : vector<8x128xf32>
    %40 = vector.extract_strided_slice %12 {offsets = [56, 0], sizes = [8, 128], strides = [1, 1]} : vector<64x128xf32> to vector<8x128xf32>
    %cst_16 = arith.constant dense<0.000000e+00> : vector<8x128xf32>
    %41 = tpu.matmul %39, %13, %cst_16 {dimension_numbers = #tpu.dot_dimension_numbers<[1], [0], [0], [1], [0, 0, 1, 1], [], []>} : vector<8x128xf32>, vector<128x128xf32>, vector<8x128xf32> -> vector<8x128xf32>
    %42 = arith.addf %40, %41 : vector<8x128xf32>
    %43 = math.tanh %42 : vector<8x128xf32>
    %c0_17 = arith.constant 0 : index
    %c0_18 = arith.constant 0 : index
    %44 = vector.load %arg5[%c0_17, %c0_18] : memref<128x128xf32, #tpu.memory_space<vmem>>, vector<128x128xf32>
    %cst_19 = arith.constant dense<0.000000e+00> : vector<8x128xf32>
    %45 = tpu.matmul %43, %44, %cst_19 {dimension_numbers = #tpu.dot_dimension_numbers<[1], [0], [0], [1], [0, 0, 1, 1], [], []>} : vector<8x128xf32>, vector<128x128xf32>, vector<8x128xf32> -> vector<8x128xf32>
    %c0_20 = arith.constant 0 : index
    %c0_21 = arith.constant 0 : index
    %46 = vector.load %arg6[%c0_20, %c0_21] : memref<1x128xf32, #tpu.memory_space<vmem>>, vector<1x128xf32>
    %47 = vector.broadcast %46 : vector<1x128xf32> to vector<8x128xf32>
    %48 = arith.addf %45, %47 : vector<8x128xf32>
    %c0_22 = arith.constant 0 : index
    %c0_23 = arith.constant 0 : index
    %49 = vector.load %arg7[%c0_22, %c0_23] : memref<8x128xf32, #tpu.memory_space<vmem>>, vector<8x128xf32>
    tpu.vector_store %arg7[%c0_22, %c0_23], %48 {strides = array<i32>} : memref<8x128xf32, #tpu.memory_space<vmem>>, vector<8x128xf32>,
    return
  }
}

</mosaic_0001>

<bundles_post_ra>
// kernel: tpu_custom_call.1
= control target key start
LH: loop header
LB: loop body
LE: loop exit
PB: predicated region body
PF: predicated region fallthrough
CT: control target
= control target key end

     0   :  { %12 = vsyncpa [#allocation3], 0  ;;  %s972_s0 = inlined_call_operand.vmem [shape: s32[64,1], index: 0, kind: input, shape index: {}]   ;;  %s973_s1 = inlined_call_operand.vmem [shape: f32[50,32], index: 1, kind: input, shape index: {}]   ;;  %s974_s2 = inlined_call_operand.hbm [shape: f32[32,128], index: 2, kind: input, shape index: {}]   ;;  %s975_s3 = inlined_call_operand.vmem [shape: f32[128,128], index: 3, kind: input, shape index: {}]   ;;  %s976_s4 = inlined_call_operand.vmem [shape: f32[1,128], index: 4, kind: input, shape index: {}]   ;;  %s977_s5 = inlined_call_operand.hbm [shape: f32[128,128], index: 5, kind: input, shape index: {}]   ;;  %s978_s6 = inlined_call_operand.vmem [shape: f32[1,128], index: 6, kind: input, shape index: {}]   ;;  %s979_s7 = inlined_call_operand.hbm [shape: f32[8,128], index: 7, kind: output, shape index: {}]  }
   0x1   :  { %13 = vsyncpa [#allocation6], 0 }
   0x2   :  { %14 = vsyncpa [#allocation4], 0  ;;  %s23_s26 = sshll.u32 %s974_s2, 4  ;;  %s629_s27 = smov [#allocation2]   ;;  %s24_s26 = int_to_ptr.hbm [resolvable:$true] %s23_s26 }
   0x3   :  { %s25_s28 = sshll.u32 %s629_s27, 4  ;;  %s40_s8 = sshll.u32 %s977_s5, 4  ;;  %s26_s28 = int_to_ptr.vmem [resolvable:$true] %s25_s28  ;;  %s41_s8 = int_to_ptr.hbm [resolvable:$true] %s40_s8 }
   0x4   :  { %s630_s9 = smov 128   ;;  %s631_s10 = smov 8  }
   0x5   :  { %31 = dma.hbm_to_vmem [thread:$0]  %s24_s26, 512, %s26_s28, [#allocation3], %s630_s9, %s630_s9, %s631_s10  }
   0x6   :  { %s632_s11 = smov [#allocation5]  }
   0x7   :  { %s42_s12 = sshll.u32 %s632_s11, 4  ;;  %s43_s12 = int_to_ptr.vmem [resolvable:$true] %s42_s12 }
   0x8   :  { %48 = dma.hbm_to_vmem [thread:$0]  %s41_s8, 2048, %s43_s12, [#allocation6], %s630_s9, %s630_s9, %s631_s10  }
   0x9   :  { %623 = dma.done.wait [#allocation3], 512  }
   0xa   :  { %624 = vsyncadd [#allocation3], 4294966784 }
   0xb   :  { %625 = dma.done.wait [#allocation6], 2048  }
   0xc   :  { %626 = vsyncadd [#allocation6], 4294965248  ;;  %v633_v0 = vmov 0   ;;  %v59_v1 = vld [vmem:[%s972_s0] sm:$0xff]  ;;  %v61_v2 = vld [vmem:[%s972_s0 + $0x10] sm:$0xff]  ;;  %vm149_vm0 = vcmask 1041408   ;;  %v67_v15 = vlaneseq }
   0xd   :  { %530 = vset.pattern.permute.xlu0 %v633_v0  ;;  %531 = vset.pattern.permute.xlu1 %v633_v0  ;;  %v63_v3 = vld [vmem:[%s972_s0 + $0x20] sm:$0xff]  ;;  %v123_v4 = vld [vmem:[%s973_s1 + $0x30] sm:$0x3]  ;;  %v122_v5 = vld [vmem:[%s973_s1 + $0x28] sm:$0xff]  ;;  %vm124_vm1 = vcmask 408576   ;;  %v634_v18 = vmov 0.0  }
   0xe   :  { %532 = vset.pattern.permute.xlu2 %v633_v0  ;;  %70 = vperm.xlu0 %530, %v59_v1   ;;  %v121_v6 = vld [vmem:[%s973_s1 + $0x20] sm:$0xff]  ;;  %v60_v7 = vld [vmem:[%s972_s0 + $0x8] sm:$0xff]  ;;  %v62_v8 = vld [vmem:[%s972_s0 + $0x18] sm:$0xff]  ;;  %v724_v16 = vand.u32 127, %v67_v15  ;;  %vm202_vm9 = vcmask 261120   ;;  %s635_s21 = smov [#allocation7]  }
   0xf   :  { %76 = vperm.xlu1 %531, %v61_v2   ;;  %82 = vperm.xlu2 %532, %v63_v3   ;;  %v64_v9 = vld [vmem:[%s972_s0 + $0x28] sm:$0xff]  ;;  %v120_v10 = vld [vmem:[%s973_s1 + $0x18] sm:$0xff]  ;;  %v119_v11 = vld [vmem:[%s973_s1 + $0x10] sm:$0xff]  ;;  %s485_s22 = sshll.u32 %s635_s21, 4  ;;  %s487_s25 = sshll.u32 %s979_s7, 4  ;;  %s486_s22 = int_to_ptr.vmem [resolvable:$true] %s485_s22  ;;  %s488_s25 = int_to_ptr.hbm [resolvable:$true] %s487_s25 }
  0x10   :  { %506 = vmatpush.msk.msra.mxu0 %vm149_vm0, %v123_v4  ;;  %v118_v12 = vld [vmem:[%s973_s1 + $0x8] sm:$0xff]  ;;  %v65_v13 = vld [vmem:[%s972_s0 + $0x30] sm:$0xff]  ;;  %v117_v14 = vld [vmem:[%s973_s1] sm:$0xff] }
  0x11   :  { %v197_v25 = vld [vmem:[#allocation2 + $0x18] sm:$0xff]  ;;  %v196_v26 = vld [vmem:[#allocation2 + $0x10] sm:$0xff]  ;;  %v195_v27 = vld [vmem:[#allocation2 + $0x8] sm:$0xff] }
  0x12   :  { %163 = vmatpush.msra.mxu0 %v122_v5  ;;  %239 = vmatpush.msra.mxu1 %v197_v25  ;;  %v194_v35 = vld [vmem:[#allocation2] sm:$0xff]  ;;  %v66_v37 = vld [vmem:[%s972_s0 + $0x38] sm:$0xff]  ;;  %v761_v41 = vld [vmem:[%s975_s3 + $0x70] sm:$0xff] }
  0x13   :  { %v756_v40 = vld [vmem:[%s975_s3 + $0x78] sm:$0xff]  ;;  %v768_v42 = vld [vmem:[%s975_s3 + $0x68] sm:$0xff]  ;;  %v777_v43 = vld [vmem:[%s975_s3 + $0x60] sm:$0xff] }
  0x14   :  { %164 = vmatpush.msra.mxu0 %v121_v6  ;;  %240 = vmatpush.msra.mxu1 %v196_v26  ;;  %v786_v44 = vld [vmem:[%s975_s3 + $0x58] sm:$0xff]  ;;  %v796_v46 = vld [vmem:[%s975_s3 + $0x50] sm:$0xff]  ;;  %v804_v47 = vld [vmem:[%s975_s3 + $0x48] sm:$0xff] }
  0x15   :  { %285 = vmatpush.msra.mxu2 %v756_v40  ;;  %307 = vmatpush.msra.mxu3 %v756_v40  ;;  %v813_v48 = vld [vmem:[%s975_s3 + $0x40] sm:$0xff]  ;;  %v822_v49 = vld [vmem:[%s975_s3 + $0x38] sm:$0xff]  ;;  %v832_v51 = vld [vmem:[%s975_s3 + $0x30] sm:$0xff] }
  0x16   :  { %73 = vperm.xlu0 %530, %v60_v7   ;;  %165 = vmatpush.msra.mxu0 %v120_v10  ;;  %v840_v52 = vld [vmem:[%s975_s3 + $0x28] sm:$0xff]  ;;  %v859_v55 = vld [vmem:[%s975_s3 + $0x20] sm:$0xff]  ;;  %v866_v56 = vld [vmem:[%s975_s3 + $0x18] sm:$0xff] }
  0x17   :  { %79 = vperm.xlu1 %531, %v62_v8   ;;  %85 = vperm.xlu2 %532, %v64_v9   ;;  %v874_v57 = vld [vmem:[%s975_s3 + $0x10] sm:$0xff]  ;;  %v880_v58 = vld [vmem:[%s975_s3 + $0x8] sm:$0xff]  ;;  %v893_v59 = vld [vmem:[%s975_s3] sm:$0xff] }
  0x18   :  { %166 = vmatpush.msra.mxu0 %v119_v11  ;;  %241 = vmatpush.msra.mxu1 %v195_v27  ;;  %v926_v62 = vld [vmem:[%s976_s4] ss:$0 sm:$0xff] }
  0x19   :  { %286 = vmatpush.msra.mxu2 %v761_v41  ;;  %308 = vmatpush.msra.mxu3 %v761_v41 }
  0x1a   :  { %167 = vmatpush.msra.mxu0 %v118_v12  ;;  %242 = vmatpush.msra.mxu1 %v194_v35  ;;  %v449_v35 = vld [vmem:[#allocation5 + $0x50] sm:$0xff] }
  0x1b   :  { %287 = vmatpush.msra.mxu2 %v768_v42  ;;  %309 = vmatpush.msra.mxu3 %v768_v42 }
  0x1c   :  { %168 = vmatpush.msra.mxu0 %v117_v14  ;;  %373 = vmatpush.msrb.mxu1 %v756_v40 }
  0x1d   :  { %288 = vmatpush.msra.mxu2 %v777_v43  ;;  %310 = vmatpush.msra.mxu3 %v777_v43 }
  0x1e   :  { %88 = vperm.xlu0 %530, %v65_v13   ;;  %395 = vmatpush.msrb.mxu0 %v756_v40 }
  0x1f   :  { %91 = vperm.xlu1 %531, %v66_v37   ;;  %374 = vmatpush.msrb.mxu1 %v761_v41  ;;  %v447_v37 = vld [vmem:[#allocation5 + $0x40] sm:$0xff] }
  0x20   :  { %396 = vmatpush.msrb.mxu0 %v761_v41  ;;  %289 = vmatpush.msra.mxu2 %v786_v44 }
  0x21   :  { %375 = vmatpush.msrb.mxu1 %v768_v42  ;;  %311 = vmatpush.msra.mxu3 %v786_v44 }
  0x22   :  { %397 = vmatpush.msrb.mxu0 %v768_v42  ;;  %290 = vmatpush.msra.mxu2 %v796_v46 }
  0x23   :  { %376 = vmatpush.msrb.mxu1 %v777_v43  ;;  %312 = vmatpush.msra.mxu3 %v796_v46 }
  0x24   :  { %398 = vmatpush.msrb.mxu0 %v777_v43  ;;  %291 = vmatpush.msra.mxu2 %v804_v47 }
  0x25   :  { %377 = vmatpush.msrb.mxu1 %v786_v44  ;;  %313 = vmatpush.msra.mxu3 %v804_v47 }
  0x26   :  { %399 = vmatpush.msrb.mxu0 %v786_v44  ;;  %292 = vmatpush.msra.mxu2 %v813_v48 }
  0x27   :  { %378 = vmatpush.msrb.mxu1 %v796_v46  ;;  %314 = vmatpush.msra.mxu3 %v813_v48 }
  0x28   :  { %400 = vmatpush.msrb.mxu0 %v796_v46  ;;  %293 = vmatpush.msra.mxu2 %v822_v49 }
  0x29   :  { %315 = vmatpush.msra.mxu3 %v822_v49  ;;  %379 = vmatpush.msrb.mxu1 %v804_v47 }
  0x2a   :  { %401 = vmatpush.msrb.mxu0 %v804_v47  ;;  %294 = vmatpush.msra.mxu2 %v832_v51 }
  0x2b   :  { %316 = vmatpush.msra.mxu3 %v832_v51  ;;  %380 = vmatpush.msrb.mxu1 %v813_v48 }
  0x2c   :  { %402 = vmatpush.msrb.mxu0 %v813_v48  ;;  %295 = vmatpush.msra.mxu2 %v840_v52 }
  0x2d   :  { %317 = vmatpush.msra.mxu3 %v840_v52  ;;  %381 = vmatpush.msrb.mxu1 %v822_v49 }
  0x2e   :  { %403 = vmatpush.msrb.mxu0 %v822_v49  ;;  %296 = vmatpush.msra.mxu2 %v859_v55 }
  0x2f   :  { %382 = vmatpush.msrb.mxu1 %v832_v51  ;;  %318 = vmatpush.msra.mxu3 %v859_v55 }
  0x30   :  { %404 = vmatpush.msrb.mxu0 %v832_v51  ;;  %297 = vmatpush.msra.mxu2 %v866_v56 }
  0x31   :  { %383 = vmatpush.msrb.mxu1 %v840_v52  ;;  %319 = vmatpush.msra.mxu3 %v866_v56 }
  0x32   :  { %405 = vmatpush.msrb.mxu0 %v840_v52  ;;  %298 = vmatpush.msra.mxu2 %v874_v57 }
  0x33   :  { %384 = vmatpush.msrb.mxu1 %v859_v55  ;;  %320 = vmatpush.msra.mxu3 %v874_v57 }
  0x34   :  { %406 = vmatpush.msrb.mxu0 %v859_v55  ;;  %299 = vmatpush.msra.mxu2 %v880_v58 }
  0x35   :  { %385 = vmatpush.msrb.mxu1 %v866_v56  ;;  %321 = vmatpush.msra.mxu3 %v880_v58 }
  0x36   :  { %407 = vmatpush.msrb.mxu0 %v866_v56  ;;  %300 = vmatpush.msra.mxu2 %v893_v59 }
  0x37   :  { %386 = vmatpush.msrb.mxu1 %v874_v57  ;;  %322 = vmatpush.msra.mxu3 %v893_v59 }
  0x38   :  { %408 = vmatpush.msrb.mxu0 %v874_v57  ;;  %329 = vmatpush.msrb.mxu2 %v756_v40 }
  0x39   :  { %387 = vmatpush.msrb.mxu1 %v880_v58  ;;  %351 = vmatpush.msrb.mxu3 %v756_v40 }
  0x3a   :  { %409 = vmatpush.msrb.mxu0 %v880_v58  ;;  %330 = vmatpush.msrb.mxu2 %v761_v41 }
  0x3b   :  { %388 = vmatpush.msrb.mxu1 %v893_v59  ;;  %352 = vmatpush.msrb.mxu3 %v761_v41 }
  0x3c   :  { %410 = vmatpush.msrb.mxu0 %v893_v59  ;;  %331 = vmatpush.msrb.mxu2 %v768_v42 }
  0x3d   :  { %353 = vmatpush.msrb.mxu3 %v768_v42 }
  0x3e   :  { %332 = vmatpush.msrb.mxu2 %v777_v43 }
  0x3f   :  { %354 = vmatpush.msrb.mxu3 %v777_v43 }
  0x40   :  { %333 = vmatpush.msrb.mxu2 %v786_v44 }
  0x41   :  { %355 = vmatpush.msrb.mxu3 %v786_v44 }
  0x42   :  { %334 = vmatpush.msrb.mxu2 %v796_v46 }
  0x43   :  { %356 = vmatpush.msrb.mxu3 %v796_v46 }
  0x44   :  { %335 = vmatpush.msrb.mxu2 %v804_v47 }
  0x45   :  { %357 = vmatpush.msrb.mxu3 %v804_v47 }
  0x46   :  { %336 = vmatpush.msrb.mxu2 %v813_v48 }
  0x47   :  { %358 = vmatpush.msrb.mxu3 %v813_v48 }
  0x48   :  { %337 = vmatpush.msrb.mxu2 %v822_v49 }
  0x49   :  { %359 = vmatpush.msrb.mxu3 %v822_v49 }
  0x4a   :  { %338 = vmatpush.msrb.mxu2 %v832_v51 }
  0x4b   :  { %360 = vmatpush.msrb.mxu3 %v832_v51 }
  0x4c   :  { %339 = vmatpush.msrb.mxu2 %v840_v52 }
  0x4d   :  { %361 = vmatpush.msrb.mxu3 %v840_v52 }
  0x4e   :  { %340 = vmatpush.msrb.mxu2 %v859_v55 }
  0x4f   :  { %362 = vmatpush.msrb.mxu3 %v859_v55 }
  0x50   :  { %341 = vmatpush.msrb.mxu2 %v866_v56 }
  0x51   :  { %363 = vmatpush.msrb.mxu3 %v866_v56 }
  0x52   :  { %342 = vmatpush.msrb.mxu2 %v874_v57 }
  0x53   :  { %364 = vmatpush.msrb.mxu3 %v874_v57 }
  0x54   :  { %343 = vmatpush.msrb.mxu2 %v880_v58 }
  0x55   :  { %365 = vmatpush.msrb.mxu3 %v880_v58 }
  0x56   :  { %344 = vmatpush.msrb.mxu2 %v893_v59 }
  0x57   :  { %366 = vmatpush.msrb.mxu3 %v893_v59 }
  0x69   :  { %v83_v29 = vpop.permute.xlu2 %82 }
  0x6a   :  { %vm97_vm6 = vcmp.eq.s32.totalorder %v83_v29, %v724_v16 }
  0x6b   :  { %v502_v30 = vsel %vm97_vm6, 1.0, %v634_v18 }
  0x71   :  { %v86_v31 = vpop.permute.xlu2 %85 }
  0x72   :  { %vm98_vm7 = vcmp.eq.s32.totalorder %v86_v31, %v724_v16  ;;  %v453_v31 = vld [vmem:[#allocation5 + $0x70] sm:$0xff] }
  0x73   :  { %v503_v32 = vsel %vm98_vm7, 1.0, %v634_v18 }
  0x80   :  { %v71_v17 = vpop.permute.xlu0 %70 }
  0x81   :  { %vm93_vm2 = vcmp.eq.s32.totalorder %v71_v17, %v724_v16  ;;  %v77_v21 = vpop.permute.xlu1 %76 }
  0x82   :  { %v498_v19 = vsel %vm93_vm2, 1.0, %v634_v18  ;;  %vm95_vm4 = vcmp.eq.s32.totalorder %v77_v21, %v724_v16 }
  0x83   :  { %507 = vmatmul.msk.f32.vlgmr.msra.gmra.mxu0 %vm124_vm1, %v498_v19  ;;  %v500_v23 = vsel %vm95_vm4, 1.0, %v634_v18 }
  0x88   :  { %v74_v20 = vpop.permute.xlu0 %73 }
  0x89   :  { %vm94_vm3 = vcmp.eq.s32.totalorder %v74_v20, %v724_v16  ;;  %v80_v24 = vpop.permute.xlu1 %79 }
  0x8a   :  { %v499_v22 = vsel %vm94_vm3, 1.0, %v634_v18  ;;  %vm96_vm5 = vcmp.eq.s32.totalorder %v80_v24, %v724_v16 }
  0x8b   :  { %508 = vmatmul.msk.f32.gmra.mxu0 %vm124_vm1, %v499_v22  ;;  %v501_v28 = vsel %vm96_vm5, 1.0, %v634_v18 }
  0x90   :  { %v89_v33 = vpop.permute.xlu0 %88 }
  0x91   :  { %vm99_vm8 = vcmp.eq.s32.totalorder %v89_v33, %v724_v16  ;;  %v92_v60 = vpop.permute.xlu1 %91  ;;  %v451_v33 = vld [vmem:[#allocation5 + $0x60] sm:$0xff] }
  0x92   :  { %v504_v34 = vsel %vm99_vm8, 1.0, %v634_v18  ;;  %vm100_vm10 = vcmp.eq.s32.totalorder %v92_v60, %v724_v16 }
  0x93   :  { %509 = vmatmul.msk.f32.gmra.mxu0 %vm124_vm1, %v500_v23  ;;  %v505_v61 = vsel %vm100_vm10, 1.0, %v634_v18 }
  0x9b   :  { %510 = vmatmul.msk.f32.gmra.mxu0 %vm124_vm1, %v501_v28 }
  0xa3   :  { %511 = vmatmul.msk.f32.gmra.mxu0 %vm124_vm1, %v502_v30  ;;  %v454_v30 = vld [vmem:[#allocation5 + $0x78] sm:$0xff] }
  0xab   :  { %512 = vmatmul.msk.f32.gmra.mxu0 %vm124_vm1, %v503_v32  ;;  %v452_v32 = vld [vmem:[#allocation5 + $0x68] sm:$0xff] }
  0xb3   :  { %513 = vmatmul.msk.f32.gmra.mxu0 %vm124_vm1, %v504_v34  ;;  %v450_v34 = vld [vmem:[#allocation5 + $0x58] sm:$0xff] }
  0xbb   :  { %514 = vmatmul.msk.f32.gmra.mxu0 %vm124_vm1, %v505_v61 }
 0x100   :  { %v170_v36 = vpop.f32.mrf.mxu0 }
 0x101   :  { %515 = vmatmul.msk.f32.vlgmr.msra.gmra.mxu1 %vm202_vm9, %v170_v36  ;;  %v448_v36 = vld [vmem:[#allocation5 + $0x48] sm:$0xff] }
 0x108   :  { %v173_v38 = vpop.f32.mrf.mxu0 }
 0x109   :  { %516 = vmatmul.msk.f32.gmra.mxu1 %vm202_vm9, %v173_v38  ;;  %v446_v38 = vld [vmem:[#allocation5 + $0x38] sm:$0xff] }
 0x110   :  { %v176_v39 = vpop.f32.mrf.mxu0 }
 0x111   :  { %517 = vmatmul.msk.f32.gmra.mxu1 %vm202_vm9, %v176_v39  ;;  %v445_v39 = vld [vmem:[#allocation5 + $0x30] sm:$0xff] }
 0x118   :  { %v179_v45 = vpop.f32.mrf.mxu0 }
 0x119   :  { %518 = vmatmul.msk.f32.gmra.mxu1 %vm202_vm9, %v179_v45  ;;  %v443_v45 = vld [vmem:[#allocation5 + $0x20] sm:$0xff] }
 0x120   :  { %v182_v50 = vpop.f32.mrf.mxu0 }
 0x121   :  { %519 = vmatmul.msk.f32.gmra.mxu1 %vm202_vm9, %v182_v50 }
 0x128   :  { %v185_v53 = vpop.f32.mrf.mxu0 }
 0x129   :  { %520 = vmatmul.msk.f32.gmra.mxu1 %vm202_vm9, %v185_v53 }
 0x130   :  { %v188_v54 = vpop.f32.mrf.mxu0 }
 0x131   :  { %521 = vmatmul.msk.f32.gmra.mxu1 %vm202_vm9, %v188_v54  ;;  %v534_v54 = vld [vmem:[%s978_s6] ss:$0 sm:$0xff] }
 0x138   :  { %v191_v2 = vpop.f32.mrf.mxu0 }
 0x139   :  { %522 = vmatmul.msk.f32.gmra.mxu1 %vm202_vm9, %v191_v2 }
 0x17e   :  { %v244_v63 = vpop.f32.mrf.mxu1 }
 0x17f   :  { %v245_v0 = vadd.f32 %v926_v62, %v244_v63 }
 0x181   :  { %535 = vtanh.f32 %v245_v0 }
 0x186   :  { %v247_v3 = vpop.f32.mrf.mxu1 }
 0x187   :  { %v536_v1 = vpop.eup %535  ;;  %v248_v4 = vadd.f32 %v926_v62, %v247_v3 }
 0x188   :  { %301 = vmatmul.f32.vlgmr.msra.gmra.mxu2 %v536_v1 }
 0x189   :  { %417 = vmatpush.msra.mxu2 %v756_v40  ;;  %v444_v40 = vld [vmem:[#allocation5 + $0x28] sm:$0xff] }
 0x18b   :  { %418 = vmatpush.msra.mxu2 %v761_v41 }
 0x18d   :  { %419 = vmatpush.msra.mxu2 %v768_v42 }
 0x18e   :  { %v250_v8 = vpop.f32.mrf.mxu1 }
 0x18f   :  { %420 = vmatpush.msra.mxu2 %v777_v43  ;;  %v251_v9 = vadd.f32 %v926_v62, %v250_v8 }
 0x191   :  { %421 = vmatpush.msra.mxu2 %v786_v44 }
 0x193   :  { %422 = vmatpush.msra.mxu2 %v796_v46  ;;  %v442_v46 = vld [vmem:[#allocation5 + $0x18] sm:$0xff] }
 0x195   :  { %423 = vmatpush.msra.mxu2 %v804_v47  ;;  %v441_v47 = vld [vmem:[#allocation5 + $0x10] sm:$0xff] }
 0x196   :  { %v253_v13 = vpop.f32.mrf.mxu1 }
 0x197   :  { %424 = vmatpush.msra.mxu2 %v813_v48  ;;  %v254_v14 = vadd.f32 %v926_v62, %v253_v13  ;;  %v440_v48 = vld [vmem:[#allocation5 + $0x8] sm:$0xff] }
 0x199   :  { %425 = vmatpush.msra.mxu2 %v822_v49  ;;  %v439_v49 = vld [vmem:[#allocation5] sm:$0xff] }
 0x19b   :  { %426 = vmatpush.msra.mxu2 %v832_v51 }
 0x19d   :  { %427 = vmatpush.msra.mxu2 %v840_v52 }
 0x19e   :  { %v256_v18 = vpop.f32.mrf.mxu1 }
 0x19f   :  { %428 = vmatpush.msra.mxu2 %v859_v55  ;;  %v257_v19 = vadd.f32 %v926_v62, %v256_v18 }
 0x1a1   :  { %429 = vmatpush.msra.mxu2 %v866_v56 }
 0x1a3   :  { %430 = vmatpush.msra.mxu2 %v874_v57 }
 0x1a5   :  { %431 = vmatpush.msra.mxu2 %v880_v58 }
 0x1a6   :  { %v259_v23 = vpop.f32.mrf.mxu1 }
 0x1a7   :  { %432 = vmatpush.msra.mxu2 %v893_v59  ;;  %v260_v26 = vadd.f32 %v926_v62, %v259_v23 }
 0x1ae   :  { %v262_v24 = vpop.f32.mrf.mxu1 }
 0x1af   :  { %v263_v41 = vadd.f32 %v926_v62, %v262_v24 }
 0x1b6   :  { %v265_v25 = vpop.f32.mrf.mxu1 }
 0x1b7   :  { %v266_v50 = vadd.f32 %v926_v62, %v265_v25 }
 0x20b   :  { %v302_v5 = vpop.f32.mrf.mxu2 }
 0x20c   :  { %v305_v6 = vadd.f32 %v302_v5, %v248_v4 }
 0x20e   :  { %537 = vtanh.f32 %v305_v6 }
 0x214   :  { %v538_v7 = vpop.eup %537 }
 0x215   :  { %323 = vmatmul.f32.vlgmr.msra.gmra.mxu3 %v538_v7 }
 0x216   :  { %459 = vmatpush.msra.mxu3 %v454_v30 }
 0x218   :  { %460 = vmatpush.msra.mxu3 %v453_v31 }
 0x21a   :  { %461 = vmatpush.msra.mxu3 %v452_v32 }
 0x21c   :  { %462 = vmatpush.msra.mxu3 %v451_v33 }
 0x21e   :  { %463 = vmatpush.msra.mxu3 %v450_v34 }
 0x220   :  { %464 = vmatpush.msra.mxu3 %v449_v35 }
 0x222   :  { %465 = vmatpush.msra.mxu3 %v448_v36 }
 0x224   :  { %466 = vmatpush.msra.mxu3 %v447_v37 }
 0x226   :  { %467 = vmatpush.msra.mxu3 %v446_v38 }
 0x228   :  { %468 = vmatpush.msra.mxu3 %v445_v39 }
 0x22a   :  { %469 = vmatpush.msra.mxu3 %v444_v40 }
 0x22c   :  { %470 = vmatpush.msra.mxu3 %v443_v45 }
 0x22e   :  { %471 = vmatpush.msra.mxu3 %v442_v46 }
 0x230   :  { %472 = vmatpush.msra.mxu3 %v441_v47 }
 0x232   :  { %473 = vmatpush.msra.mxu3 %v440_v48 }
 0x234   :  { %474 = vmatpush.msra.mxu3 %v439_v49 }
 0x298   :  { %v324_v10 = vpop.f32.mrf.mxu3 }
 0x299   :  { %v327_v11 = vadd.f32 %v324_v10, %v251_v9 }
 0x29b   :  { %539 = vtanh.f32 %v327_v11 }
 0x2a1   :  { %v540_v12 = vpop.eup %539 }
 0x2a2   :  { %345 = vmatmul.f32.vlgmr.msrb.gmra.mxu2 %v540_v12 }
 0x325   :  { %v346_v15 = vpop.f32.mrf.mxu2 }
 0x326   :  { %v349_v16 = vadd.f32 %v346_v15, %v254_v14 }
 0x328   :  { %541 = vtanh.f32 %v349_v16 }
 0x32e   :  { %v542_v17 = vpop.eup %541 }
 0x32f   :  { %367 = vmatmul.f32.vlgmr.msrb.gmra.mxu3 %v542_v17 }
 0x3b2   :  { %v368_v20 = vpop.f32.mrf.mxu3 }
 0x3b3   :  { %v371_v21 = vadd.f32 %v368_v20, %v257_v19 }
 0x3b5   :  { %543 = vtanh.f32 %v371_v21 }
 0x3bb   :  { %v544_v22 = vpop.eup %543 }
 0x3bc   :  { %389 = vmatmul.f32.vlgmr.msrb.gmra.mxu1 %v544_v22 }
 0x439   :  { %v390_v27 = vpop.f32.mrf.mxu1 }
 0x43a   :  { %v393_v28 = vadd.f32 %v390_v27, %v260_v26 }
 0x43c   :  { %545 = vtanh.f32 %v393_v28 }
 0x442   :  { %v546_v29 = vpop.eup %545 }
 0x443   :  { %411 = vmatmul.f32.vlgmr.msrb.gmra.mxu0 %v546_v29 }
 0x4c0   :  { %v412_v42 = vpop.f32.mrf.mxu0 }
 0x4c1   :  { %v415_v43 = vadd.f32 %v412_v42, %v263_v41 }
 0x4c3   :  { %547 = vtanh.f32 %v415_v43 }
 0x4c9   :  { %v548_v44 = vpop.eup %547 }
 0x4ca   :  { %433 = vmatmul.f32.vlgmr.msra.gmra.mxu2 %v548_v44 }
 0x54d   :  { %v434_v51 = vpop.f32.mrf.mxu2 }
 0x54e   :  { %v437_v52 = vadd.f32 %v434_v51, %v266_v50 }
 0x550   :  { %549 = vtanh.f32 %v437_v52 }
 0x556   :  { %v550_v53 = vpop.eup %549 }
 0x557   :  { %475 = vmatmul.f32.vlgmr.msra.gmra.mxu3 %v550_v53 }
 0x5da   :  { %v476_v55 = vpop.f32.mrf.mxu3 }
 0x5db   :  { %v477_v56 = vadd.f32 %v534_v54, %v476_v55 }
 0x5dd   :  { %479 = vst [vmem:[#allocation7] sm:$0xff] %v477_v56 }
 0x5de   :  { %490 = dma.vmem_to_hbm [thread:$0]  %s486_s22, 128, %s488_s25, [#allocation4]  }
 0x5df   :  { %627 = dma.done.wait [#allocation4], 128  }
 0x5e0   :  { %628 = vsyncadd [#allocation4], 4294967168 }
 0x5e1   :  { %495 = vsyncpa [#allocation3], 1 }
 0x5e2   :  { %496 = vsyncpa [#allocation6], 1 }
 0x5e3   :  { %497 = vsyncpa [#allocation4], 1 }

</bundles_post_ra>
